<compile_context>
chip_gen: v7x
topology: tpu7x:2x2x1
jax: 0.10.0
libtpu: 0.0.40
codegen_flags: <defaults>
</compile_context>

<pallas_src>
import math

import jax
import jax.numpy as jnp
from jax import lax
from jax.experimental import pallas as pl
from jax.experimental.pallas import tpu as pltpu

NEG_SLOPE = 0.01  # nn.LeakyReLU default negative_slope


def _isoftshare_kernel(x_ref, wsh_ref, bsh_ref, wqkv_ref, bqkv_ref,
                       whead_ref, bhead_ref, wout_ref, bout_ref, out_ref):
    # One grid step == one head (m or l); per-head operands are already sliced
    # to this head by the BlockSpecs (head axis squeezed away).
    #   x:     (N, F)    bf16
    #   wsh:   (2, F, F) bf16   shared-layer weights, (in, out) layout
    #   bsh:   (2, 1, F) f32
    #   wqkv:  (3N, N)   bf16   [Wq^T/sqrt(N); Wk^T; Wv^T] for this head
    #   bqkv:  (3N, 1)   f32    (q bias pre-scaled)
    #   whead: (4, F, F) bf16   this head's 4 FF layers, (in, out) layout
    #   bhead: (4, 1, F) f32
    #   wout:  (F, 1)    bf16
    #   bout:  (1, 1)    f32
    #   out:   (1, N)    f32
    N = x_ref.shape[0]
    f32, bf16 = jnp.float32, jnp.bfloat16

    def leaky(h):  # one vmul + vmax instead of cmp/mul/select
        return jnp.maximum(h, NEG_SLOPE * h)

    def bdot(a_f32, w_bf16):  # bf16 MXU matmul, f32 accumulation
        return jnp.dot(a_f32.astype(bf16), w_bf16, preferred_element_type=f32)

    x = x_ref[...]  # already bf16

    # shared_layers: Linear -> Dropout(identity) -> LeakyReLU -> Linear
    # (recomputed per head; cheap relative to the head's attention + FF work)
    h0 = leaky(jnp.dot(x, wsh_ref[0], preferred_element_type=f32) + bsh_ref[0])
    shared = bdot(h0, wsh_ref[1]) + bsh_ref[1]                      # (N, F) f32
    shared_b = shared.astype(bf16)

    # Lane-dense Q/K/V for this head: (3N, N) @ (N, F) -> (3N, F)
    qkvT = jnp.dot(wqkv_ref[...], shared_b,
                   preferred_element_type=f32) + bqkv_ref[...]
    qT = qkvT[0 * N:1 * N]
    kT = qkvT[1 * N:2 * N]
    vT = qkvT[2 * N:3 * N]

    # scores (F, F): contract the N axis (1/sqrt(N) already folded into Wq)
    s = lax.dot_general(qT.astype(bf16), kT.astype(bf16),
                        (((0,), (0,)), ((), ())),
                        preferred_element_type=f32)
    m = jnp.max(s, axis=-1, keepdims=True)
    e = jnp.exp(s - m)
    inv = pl.reciprocal(jnp.sum(e, axis=-1, keepdims=True), approx=True)
    w = e * inv
    # attended^T (N, F): contract the key-feature axis of vT and w, + residual
    att = lax.dot_general(vT.astype(bf16), w.astype(bf16),
                          (((1,), (1,)), ((), ())),
                          preferred_element_type=f32) + shared

    # TODO(synk): row-tile s/e/w and stream whead per layer for F >~ 1-1.5K.

    # This head's 4-layer FF stack: plain (N,F)@(F,F) matmuls (un-fused).
    h = att
    for i in range(4):
        h = leaky(bdot(h, whead_ref[i]) + bhead_ref[i])

    # Final F -> 1 projection, emitted lane-dense as a (1, N) row.
    out_ref[...] = lax.dot_general(wout_ref[...], h.astype(bf16),
                                   (((0,), (1,)), ((), ())),
                                   preferred_element_type=f32) + bout_ref[...]


def _pack(wff, bff, wattn, battn, wout, bout, N):
    """Pack natural (in,out)-layout params into the kernel's fused operands."""
    bf16 = jnp.bfloat16
    F = wff.shape[-1]
    scale = 1.0 / math.sqrt(N)

    wsh = wff[0:2].astype(bf16)                                       # (2, F, F)
    bsh = bff[0:2]                                                    # (2, 1, F)

    # [m_q, m_k, m_v, l_q, l_k, l_v]; fold 1/sqrt(N) into the q projections.
    qscale = jnp.array([scale, 1.0, 1.0, scale, 1.0, 1.0], jnp.float32)
    wqkv = (jnp.transpose(wattn, (0, 2, 1)) * qscale[:, None, None]) \
        .reshape(2, 3 * N, N).astype(bf16)                            # (2, 3N, N)
    bqkv = (battn * qscale[:, None, None]).reshape(2, 3 * N, 1)       # (2, 3N, 1)

    whead = wff[2:10].reshape(2, 4, F, F).astype(bf16)                # (2, 4, F, F)
    bhead = bff[2:10].reshape(2, 4, 1, F)                             # (2, 4, 1, F)

    woutp = wout.astype(bf16)                                         # (2, F, 1)
    boutp = bout                                                      # (2, 1, 1)
    return wsh, bsh, wqkv, bqkv, whead, bhead, woutp, boutp


def _vmem_limit_bytes(hint_bytes):
    """Generation-aware VMEM request with headroom for compiler scratch."""
    try:
        cap = int(pltpu.get_tpu_info().vmem_capacity_bytes)
    except Exception:
        cap = 64 * 1024 * 1024  # safe on every generation (v7x physical = 64 MiB)
    ceiling = cap - max(cap // 8, 8 * 1024 * 1024)   # 112 MiB v5e/v6e, 56 MiB v7x
    want = max(32 * 1024 * 1024, int(hint_bytes))
    return int(min(ceiling, want))


@jax.jit
def isoftshare_forward(x, wff, bff, wattn, battn, wout, bout):
    N, F = x.shape
    # Lane/sublane-aligned fast path; other shapes would cross (8,128) tiles.
    assert N % 8 == 0 and F % 128 == 0, "kernel assumes N % 8 == 0 and F % 128 == 0"

    ops = (x.astype(jnp.bfloat16),) + _pack(wff, bff, wattn, battn, wout, bout, N)
    (x_b, wsh, bsh, wqkv, bqkv, whead, bhead, woutp, boutp) = ops

    operand_bytes = sum(int(a.size) * a.dtype.itemsize for a in ops)
    # Live per-step set: double-buffered per-head weights + (F,F) f32 softmax
    # temporaries + small activations.
    scratch_bytes = 4 * (3 * F * F + 8 * N * F)
    vmem_limit = _vmem_limit_bytes(4 * operand_bytes + 2 * scratch_bytes)

    flops = int(32 * N * F * F + 12 * N * N * F + 4 * N * F)
    cost = pl.CostEstimate(flops=flops,
                           transcendentals=int(2 * F * F + 4 * F),
                           bytes_accessed=int(operand_bytes + 2 * N * 4))

    grid_spec = pltpu.PrefetchScalarGridSpec(
        num_scalar_prefetch=0,
        grid=(2,),                                                   # head axis
        in_specs=[
            pl.BlockSpec((N, F), lambda h: (0, 0)),                  # x
            pl.BlockSpec((2, F, F), lambda h: (0, 0, 0)),            # wsh
            pl.BlockSpec((2, 1, F), lambda h: (0, 0, 0)),            # bsh
            pl.BlockSpec((None, 3 * N, N), lambda h: (h, 0, 0)),     # wqkv
            pl.BlockSpec((None, 3 * N, 1), lambda h: (h, 0, 0)),     # bqkv
            pl.BlockSpec((None, 4, F, F), lambda h: (h, 0, 0, 0)),   # whead
            pl.BlockSpec((None, 4, 1, F), lambda h: (h, 0, 0, 0)),   # bhead
            pl.BlockSpec((None, F, 1), lambda h: (h, 0, 0)),         # wout
            pl.BlockSpec((None, 1, 1), lambda h: (h, 0, 0)),         # bout
        ],
        out_specs=pl.BlockSpec((None, 1, N), lambda h: (h, 0, 0)),
    )

    out = pl.pallas_call(
        _isoftshare_kernel,
        out_shape=jax.ShapeDtypeStruct((2, 1, N), jnp.float32),
        grid_spec=grid_spec,
        compiler_params=pltpu.CompilerParams(
            dimension_semantics=("parallel",),   # head m / head l -> 2 TCs on v7x
            vmem_limit_bytes=vmem_limit),
        cost_estimate=cost,
    )(*ops)
    # .squeeze() in the PyTorch forward: (N, 1) -> (N,)
    return out[0, 0], out[1, 0]


def init_params(key, N, F):
    keys = jax.random.split(key, 6)
    s = 0.1
    wff = s * jax.random.normal(keys[0], (10, F, F), jnp.float32)   # [sh0, sh1, m0..3, l0..3]
    bff = s * jax.random.normal(keys[1], (10, 1, F), jnp.float32)
    wattn = s * jax.random.normal(keys[2], (6, N, N), jnp.float32)  # [m_q,m_k,m_v,l_q,l_k,l_v]
    battn = s * jax.random.normal(keys[3], (6, 1, N), jnp.float32)
    wout = s * jax.random.normal(keys[4], (2, F, 1), jnp.float32)   # [m_out, l_out]
    bout = s * jax.random.normal(keys[5], (2, 1, 1), jnp.float32)
    return wff, bff, wattn, battn, wout, bout


def reference(x, wff, bff, wattn, battn, wout, bout):
    """Plain-JAX mirror of the PyTorch forward (dropout = identity), with matmul
    inputs quantized to bf16 to match the kernel's MXU precision."""
    f32, bf = jnp.float32, jnp.bfloat16
    q16 = lambda a: a.astype(bf).astype(f32)
    leaky = lambda h: jnp.where(h > 0, h, NEG_SLOPE * h)
    N = x.shape[0]
    scale = 1.0 / math.sqrt(N)

    def linear(h, w, b):
        return q16(h) @ q16(w) + b

    def attention(h, base):
        h1 = h.T
        qq = q16(h1) @ q16(wattn[base + 0] * scale) + battn[base + 0] * scale
        kk = q16(h1) @ q16(wattn[base + 1]) + battn[base + 1]
        vv = q16(h1) @ q16(wattn[base + 2]) + battn[base + 2]
        s = q16(qq) @ q16(kk).T
        w = jax.nn.softmax(s, axis=-1)
        return (q16(w) @ q16(vv)).T

    shared = linear(leaky(linear(x, wff[0], bff[0])), wff[1], bff[1])
    att_m = attention(shared, 0) + shared
    att_l = attention(shared, 3) + shared

    def head(h, w0, oi):
        for j in range(4):
            h = leaky(linear(h, wff[w0 + j], bff[w0 + j]))
        return (q16(h) @ q16(wout[oi]) + bout[oi])[:, 0]

    return head(att_m, 2, 0), head(att_l, 6, 1)


if __name__ == "__main__":
    N, F = 8, 128  # batch rows, in_features
    key = jax.random.PRNGKey(0)
    kx, kp = jax.random.split(key)
    x = jax.random.normal(kx, (N, F), jnp.float32)
    params = init_params(kp, N, F)

    out_m, out_l = isoftshare_forward(x, *params)
    jax.block_until_ready((out_m, out_l))

    ref_m, ref_l = reference(x, *params)
    assert out_m.shape == (N,) and out_l.shape == (N,)
    assert jnp.allclose(out_m, ref_m, atol=2e-2, rtol=2e-2)
    assert jnp.allclose(out_l, ref_l, atol=2e-2, rtol=2e-2)
    print("KERNEL_OK")
</pallas_src>

<mosaic_0001>
module attributes {stable_mosaic.version = 11 : i64} {
  func.func @_isoftshare_kernel(%arg0: i32, %arg1: memref<8x128xbf16, #tpu.memory_space<vmem>>, %arg2: memref<2x128x128xbf16, #tpu.memory_space<vmem>>, %arg3: memref<2x1x128xf32, #tpu.memory_space<vmem>>, %arg4: memref<1x24x8xbf16, #tpu.memory_space<vmem>>, %arg5: memref<1x24x1xf32, #tpu.memory_space<vmem>>, %arg6: memref<1x4x128x128xbf16, #tpu.memory_space<vmem>>, %arg7: memref<1x4x1x128xf32, #tpu.memory_space<vmem>>, %arg8: memref<1x128x1xbf16, #tpu.memory_space<vmem>>, %arg9: memref<1x1x1xf32, #tpu.memory_space<vmem>>, %arg10: memref<1x1x8xf32, #tpu.memory_space<vmem>>) attributes {dimension_semantics = [#tpu.dimension_semantics<parallel>], iteration_bounds = array<i64: 2>, scalar_prefetch = 0 : i64, scratch_operands = 0 : i64, tpu.core_type = #tpu.core_type<tc>, window_params = [{pipeline_mode = #tpu.pipeline_mode<synchronous>, transform_indices = @transform_0, window_bounds = array<i64: 8, 128>}, {pipeline_mode = #tpu.pipeline_mode<synchronous>, transform_indices = @transform_1, window_bounds = array<i64: 2, 128, 128>}, {pipeline_mode = #tpu.pipeline_mode<synchronous>, transform_indices = @transform_2, window_bounds = array<i64: 2, 1, 128>}, {transform_indices = @transform_3, window_bounds = array<i64: 1, 24, 8>}, {transform_indices = @transform_4, window_bounds = array<i64: 1, 24, 1>}, {transform_indices = @transform_5, window_bounds = array<i64: 1, 4, 128, 128>}, {transform_indices = @transform_6, window_bounds = array<i64: 1, 4, 1, 128>}, {transform_indices = @transform_7, window_bounds = array<i64: 1, 128, 1>}, {transform_indices = @transform_8, window_bounds = array<i64: 1, 1, 1>}, {transform_indices = @transform_9, window_bounds = array<i64: 1, 1, 8>}]} {
    %c0 = arith.constant 0 : index
    %c0_0 = arith.constant 0 : index
    %0 = vector.load %arg1[%c0, %c0_0] : memref<8x128xbf16, #tpu.memory_space<vmem>>, vector<8x128xbf16>
    %c0_1 = arith.constant 0 : index
    %c0_2 = arith.constant 0 : index
    %c0_3 = arith.constant 0 : index
    %1 = vector.load %arg2[%c0_1, %c0_2, %c0_3] : memref<2x128x128xbf16, #tpu.memory_space<vmem>>, vector<1x128x128xbf16>
    %2 = vector.shape_cast %1 : vector<1x128x128xbf16> to vector<128x128xbf16>
    %cst = arith.constant dense<0.000000e+00> : vector<8x128xf32>
    %3 = tpu.matmul %0, %2, %cst {dimension_numbers = #tpu.dot_dimension_numbers<[1], [0], [0], [1], [0, 0, 1, 1], [], []>} : vector<8x128xbf16>, vector<128x128xbf16>, vector<8x128xf32> -> vector<8x128xf32>
    %c0_4 = arith.constant 0 : index
    %c0_5 = arith.constant 0 : index
    %c0_6 = arith.constant 0 : index
    %4 = vector.load %arg3[%c0_4, %c0_5, %c0_6] : memref<2x1x128xf32, #tpu.memory_space<vmem>>, vector<1x1x128xf32>
    %5 = vector.shape_cast %4 : vector<1x1x128xf32> to vector<1x128xf32>
    %6 = vector.broadcast %5 : vector<1x128xf32> to vector<8x128xf32>
    %7 = arith.addf %3, %6 : vector<8x128xf32>
    %cst_7 = arith.constant 0.00999999977 : f32
    %8 = vector.broadcast %cst_7 : f32 to vector<8x128xf32>
    %9 = arith.mulf %8, %7 : vector<8x128xf32>
    %10 = arith.maximumf %7, %9 : vector<8x128xf32>
    %c1 = arith.constant 1 : index
    %c0_8 = arith.constant 0 : index
    %c0_9 = arith.constant 0 : index
    %11 = vector.load %arg2[%c1, %c0_8, %c0_9] : memref<2x128x128xbf16, #tpu.memory_space<vmem>>, vector<1x128x128xbf16>
    %12 = vector.shape_cast %11 : vector<1x128x128xbf16> to vector<128x128xbf16>
    %13 = arith.truncf %10 : vector<8x128xf32> to vector<8x128xbf16>
    %cst_10 = arith.constant dense<0.000000e+00> : vector<8x128xf32>
    %14 = tpu.matmul %13, %12, %cst_10 {dimension_numbers = #tpu.dot_dimension_numbers<[1], [0], [0], [1], [0, 0, 1, 1], [], []>} : vector<8x128xbf16>, vector<128x128xbf16>, vector<8x128xf32> -> vector<8x128xf32>
    %c1_11 = arith.constant 1 : index
    %c0_12 = arith.constant 0 : index
    %c0_13 = arith.constant 0 : index
    %15 = vector.load %arg3[%c1_11, %c0_12, %c0_13] : memref<2x1x128xf32, #tpu.memory_space<vmem>>, vector<1x1x128xf32>
    %16 = vector.shape_cast %15 : vector<1x1x128xf32> to vector<1x128xf32>
    %17 = vector.broadcast %16 : vector<1x128xf32> to vector<8x128xf32>
    %18 = arith.addf %14, %17 : vector<8x128xf32>
    %19 = arith.truncf %18 : vector<8x128xf32> to vector<8x128xbf16>
    %c0_14 = arith.constant 0 : index
    %c0_15 = arith.constant 0 : index
    %c0_16 = arith.constant 0 : index
    %20 = vector.load %arg4[%c0_14, %c0_15, %c0_16] : memref<1x24x8xbf16, #tpu.memory_space<vmem>>, vector<1x24x8xbf16>
    %21 = vector.shape_cast %20 : vector<1x24x8xbf16> to vector<24x8xbf16>
    %cst_17 = arith.constant dense<0.000000e+00> : vector<24x128xf32>
    %22 = tpu.matmul %21, %19, %cst_17 {dimension_numbers = #tpu.dot_dimension_numbers<[1], [0], [0], [1], [0, 0, 1, 1], [], []>} : vector<24x8xbf16>, vector<8x128xbf16>, vector<24x128xf32> -> vector<24x128xf32>
    %c0_18 = arith.constant 0 : index
    %c0_19 = arith.constant 0 : index
    %c0_20 = arith.constant 0 : index
    %23 = vector.load %arg5[%c0_18, %c0_19, %c0_20] : memref<1x24x1xf32, #tpu.memory_space<vmem>>, vector<1x24x1xf32>
    %24 = vector.shape_cast %23 : vector<1x24x1xf32> to vector<24x1xf32>
    %25 = vector.broadcast %24 : vector<24x1xf32> to vector<24x128xf32>
    %26 = arith.addf %22, %25 : vector<24x128xf32>
    %27 = vector.extract_strided_slice %26 {offsets = [0, 0], sizes = [8, 128], strides = [1, 1]} : vector<24x128xf32> to vector<8x128xf32>
    %28 = vector.extract_strided_slice %26 {offsets = [8, 0], sizes = [8, 128], strides = [1, 1]} : vector<24x128xf32> to vector<8x128xf32>
    %29 = vector.extract_strided_slice %26 {offsets = [16, 0], sizes = [8, 128], strides = [1, 1]} : vector<24x128xf32> to vector<8x128xf32>
    %30 = arith.truncf %27 : vector<8x128xf32> to vector<8x128xbf16>
    %31 = arith.truncf %28 : vector<8x128xf32> to vector<8x128xbf16>
    %cst_21 = arith.constant dense<0.000000e+00> : vector<128x128xf32>
    %32 = tpu.matmul %30, %31, %cst_21 {dimension_numbers = #tpu.dot_dimension_numbers<[0], [0], [1], [1], [0, 1, 1, 1], [], []>} : vector<8x128xbf16>, vector<8x128xbf16>, vector<128x128xf32> -> vector<128x128xf32>
    %cst_22 = arith.constant dense<0xFF800000> : vector<128xf32>
    %33 = vector.multi_reduction <maximumf>, %32, %cst_22 [1] : vector<128x128xf32> to vector<128xf32>
    %34 = vector.shape_cast %33 : vector<128xf32> to vector<128x1xf32>
    %35 = vector.broadcast %34 : vector<128x1xf32> to vector<128x128xf32>
    %36 = arith.subf %32, %35 : vector<128x128xf32>
    %37 = math.exp %36 : vector<128x128xf32>
    %cst_23 = arith.constant dense<0.000000e+00> : vector<128xf32>
    %38 = vector.multi_reduction <add>, %37, %cst_23 [1] : vector<128x128xf32> to vector<128xf32>
    %39 = vector.shape_cast %38 : vector<128xf32> to vector<128x1xf32>
    %40 = tpu.reciprocal %39 {approx = true} : vector<128x1xf32> -> vector<128x1xf32>
    %41 = vector.broadcast %40 : vector<128x1xf32> to vector<128x128xf32>
    %42 = arith.mulf %37, %41 : vector<128x128xf32>
    %43 = arith.truncf %29 : vector<8x128xf32> to vector<8x128xbf16>
    %44 = arith.truncf %42 : vector<128x128xf32> to vector<128x128xbf16>
    %cst_24 = arith.constant dense<0.000000e+00> : vector<8x128xf32>
    %45 = tpu.matmul %43, %44, %cst_24 {dimension_numbers = #tpu.dot_dimension_numbers<[1], [1], [0], [0], [0, 0, 1, 0], [], []>} : vector<8x128xbf16>, vector<128x128xbf16>, vector<8x128xf32> -> vector<8x128xf32>
    %46 = arith.addf %45, %18 : vector<8x128xf32>
    %c0_25 = arith.constant 0 : index
    %c0_26 = arith.constant 0 : index
    %c0_27 = arith.constant 0 : index
    %c0_28 = arith.constant 0 : index
    %47 = vector.load %arg6[%c0_25, %c0_26, %c0_27, %c0_28] : memref<1x4x128x128xbf16, #tpu.memory_space<vmem>>, vector<1x1x128x128xbf16>
    %48 = vector.shape_cast %47 : vector<1x1x128x128xbf16> to vector<128x128xbf16>
    %49 = arith.truncf %46 : vector<8x128xf32> to vector<8x128xbf16>
    %cst_29 = arith.constant dense<0.000000e+00> : vector<8x128xf32>
    %50 = tpu.matmul %49, %48, %cst_29 {dimension_numbers = #tpu.dot_dimension_numbers<[1], [0], [0], [1], [0, 0, 1, 1], [], []>} : vector<8x128xbf16>, vector<128x128xbf16>, vector<8x128xf32> -> vector<8x128xf32>
    %c0_30 = arith.constant 0 : index
    %c0_31 = arith.constant 0 : index
    %c0_32 = arith.constant 0 : index
    %c0_33 = arith.constant 0 : index
    %51 = vector.load %arg7[%c0_30, %c0_31, %c0_32, %c0_33] : memref<1x4x1x128xf32, #tpu.memory_space<vmem>>, vector<1x1x1x128xf32>
    %52 = vector.shape_cast %51 : vector<1x1x1x128xf32> to vector<1x128xf32>
    %53 = vector.broadcast %52 : vector<1x128xf32> to vector<8x128xf32>
    %54 = arith.addf %50, %53 : vector<8x128xf32>
    %cst_34 = arith.constant 0.00999999977 : f32
    %55 = vector.broadcast %cst_34 : f32 to vector<8x128xf32>
    %56 = arith.mulf %55, %54 : vector<8x128xf32>
    %57 = arith.maximumf %54, %56 : vector<8x128xf32>
    %c0_35 = arith.constant 0 : index
    %c1_36 = arith.constant 1 : index
    %c0_37 = arith.constant 0 : index
    %c0_38 = arith.constant 0 : index
    %58 = vector.load %arg6[%c0_35, %c1_36, %c0_37, %c0_38] : memref<1x4x128x128xbf16, #tpu.memory_space<vmem>>, vector<1x1x128x128xbf16>
    %59 = vector.shape_cast %58 : vector<1x1x128x128xbf16> to vector<128x128xbf16>
    %60 = arith.truncf %57 : vector<8x128xf32> to vector<8x128xbf16>
    %cst_39 = arith.constant dense<0.000000e+00> : vector<8x128xf32>
    %61 = tpu.matmul %60, %59, %cst_39 {dimension_numbers = #tpu.dot_dimension_numbers<[1], [0], [0], [1], [0, 0, 1, 1], [], []>} : vector<8x128xbf16>, vector<128x128xbf16>, vector<8x128xf32> -> vector<8x128xf32>
    %c0_40 = arith.constant 0 : index
    %c1_41 = arith.constant 1 : index
    %c0_42 = arith.constant 0 : index
    %c0_43 = arith.constant 0 : index
    %62 = vector.load %arg7[%c0_40, %c1_41, %c0_42, %c0_43] : memref<1x4x1x128xf32, #tpu.memory_space<vmem>>, vector<1x1x1x128xf32>
    %63 = vector.shape_cast %62 : vector<1x1x1x128xf32> to vector<1x128xf32>
    %64 = vector.broadcast %63 : vector<1x128xf32> to vector<8x128xf32>
    %65 = arith.addf %61, %64 : vector<8x128xf32>
    %cst_44 = arith.constant 0.00999999977 : f32
    %66 = vector.broadcast %cst_44 : f32 to vector<8x128xf32>
    %67 = arith.mulf %66, %65 : vector<8x128xf32>
    %68 = arith.maximumf %65, %67 : vector<8x128xf32>
    %c0_45 = arith.constant 0 : index
    %c2 = arith.constant 2 : index
    %c0_46 = arith.constant 0 : index
    %c0_47 = arith.constant 0 : index
    %69 = vector.load %arg6[%c0_45, %c2, %c0_46, %c0_47] : memref<1x4x128x128xbf16, #tpu.memory_space<vmem>>, vector<1x1x128x128xbf16>
    %70 = vector.shape_cast %69 : vector<1x1x128x128xbf16> to vector<128x128xbf16>
    %71 = arith.truncf %68 : vector<8x128xf32> to vector<8x128xbf16>
    %cst_48 = arith.constant dense<0.000000e+00> : vector<8x128xf32>
    %72 = tpu.matmul %71, %70, %cst_48 {dimension_numbers = #tpu.dot_dimension_numbers<[1], [0], [0], [1], [0, 0, 1, 1], [], []>} : vector<8x128xbf16>, vector<128x128xbf16>, vector<8x128xf32> -> vector<8x128xf32>
    %c0_49 = arith.constant 0 : index
    %c2_50 = arith.constant 2 : index
    %c0_51 = arith.constant 0 : index
    %c0_52 = arith.constant 0 : index
    %73 = vector.load %arg7[%c0_49, %c2_50, %c0_51, %c0_52] : memref<1x4x1x128xf32, #tpu.memory_space<vmem>>, vector<1x1x1x128xf32>
    %74 = vector.shape_cast %73 : vector<1x1x1x128xf32> to vector<1x128xf32>
    %75 = vector.broadcast %74 : vector<1x128xf32> to vector<8x128xf32>
    %76 = arith.addf %72, %75 : vector<8x128xf32>
    %cst_53 = arith.constant 0.00999999977 : f32
    %77 = vector.broadcast %cst_53 : f32 to vector<8x128xf32>
    %78 = arith.mulf %77, %76 : vector<8x128xf32>
    %79 = arith.maximumf %76, %78 : vector<8x128xf32>
    %c0_54 = arith.constant 0 : index
    %c3 = arith.constant 3 : index
    %c0_55 = arith.constant 0 : index
    %c0_56 = arith.constant 0 : index
    %80 = vector.load %arg6[%c0_54, %c3, %c0_55, %c0_56] : memref<1x4x128x128xbf16, #tpu.memory_space<vmem>>, vector<1x1x128x128xbf16>
    %81 = vector.shape_cast %80 : vector<1x1x128x128xbf16> to vector<128x128xbf16>
    %82 = arith.truncf %79 : vector<8x128xf32> to vector<8x128xbf16>
    %cst_57 = arith.constant dense<0.000000e+00> : vector<8x128xf32>
    %83 = tpu.matmul %82, %81, %cst_57 {dimension_numbers = #tpu.dot_dimension_numbers<[1], [0], [0], [1], [0, 0, 1, 1], [], []>} : vector<8x128xbf16>, vector<128x128xbf16>, vector<8x128xf32> -> vector<8x128xf32>
    %c0_58 = arith.constant 0 : index
    %c3_59 = arith.constant 3 : index
    %c0_60 = arith.constant 0 : index
    %c0_61 = arith.constant 0 : index
    %84 = vector.load %arg7[%c0_58, %c3_59, %c0_60, %c0_61] : memref<1x4x1x128xf32, #tpu.memory_space<vmem>>, vector<1x1x1x128xf32>
    %85 = vector.shape_cast %84 : vector<1x1x1x128xf32> to vector<1x128xf32>
    %86 = vector.broadcast %85 : vector<1x128xf32> to vector<8x128xf32>
    %87 = arith.addf %83, %86 : vector<8x128xf32>
    %cst_62 = arith.constant 0.00999999977 : f32
    %88 = vector.broadcast %cst_62 : f32 to vector<8x128xf32>
    %89 = arith.mulf %88, %87 : vector<8x128xf32>
    %90 = arith.maximumf %87, %89 : vector<8x128xf32>
    %c0_63 = arith.constant 0 : index
    %c0_64 = arith.constant 0 : index
    %c0_65 = arith.constant 0 : index
    %91 = vector.load %arg8[%c0_63, %c0_64, %c0_65] : memref<1x128x1xbf16, #tpu.memory_space<vmem>>, vector<1x128x1xbf16>
    %92 = vector.shape_cast %91 : vector<1x128x1xbf16> to vector<128x1xbf16>
    %93 = arith.truncf %90 : vector<8x128xf32> to vector<8x128xbf16>
    %cst_66 = arith.constant dense<0.000000e+00> : vector<1x8xf32>
    %94 = tpu.matmul %92, %93, %cst_66 {dimension_numbers = #tpu.dot_dimension_numbers<[0], [1], [1], [0], [0, 1, 1, 0], [], []>} : vector<128x1xbf16>, vector<8x128xbf16>, vector<1x8xf32> -> vector<1x8xf32>
    %c0_67 = arith.constant 0 : index
    %c0_68 = arith.constant 0 : index
    %c0_69 = arith.constant 0 : index
    %95 = vector.load %arg9[%c0_67, %c0_68, %c0_69] : memref<1x1x1xf32, #tpu.memory_space<vmem>>, vector<1x1x1xf32>
    %96 = vector.shape_cast %95 : vector<1x1x1xf32> to vector<1x1xf32>
    %97 = vector.broadcast %96 : vector<1x1xf32> to vector<1x8xf32>
    %98 = arith.addf %94, %97 : vector<1x8xf32>
    %c0_70 = arith.constant 0 : index
    %c0_71 = arith.constant 0 : index
    %c0_72 = arith.constant 0 : index
    %99 = vector.load %arg10[%c0_70, %c0_71, %c0_72] : memref<1x1x8xf32, #tpu.memory_space<vmem>>, vector<1x1x8xf32>
    %100 = vector.shape_cast %99 : vector<1x1x8xf32> to vector<1x8xf32>
    %101 = vector.shape_cast %98 : vector<1x8xf32> to vector<1x1x8xf32>
    tpu.vector_store %arg10[%c0_70, %c0_71, %c0_72], %101 {strides = array<i32>} : memref<1x1x8xf32, #tpu.memory_space<vmem>>, vector<1x1x8xf32>,
    return
  }
  func.func @transform_0(%arg0: i32) -> (i32, i32) {
    %c0_i32 = arith.constant 0 : i32
    %c0_i32_0 = arith.constant 0 : i32
    %c0_i32_1 = arith.constant 0 : i32
    return %c0_i32, %c0_i32_0 : i32, i32
  }
  func.func @transform_1(%arg0: i32) -> (i32, i32, i32) {
    %c0_i32 = arith.constant 0 : i32
    %c0_i32_0 = arith.constant 0 : i32
    %c0_i32_1 = arith.constant 0 : i32
    %c0_i32_2 = arith.constant 0 : i32
    return %c0_i32, %c0_i32_0, %c0_i32_1 : i32, i32, i32
  }
  func.func @transform_2(%arg0: i32) -> (i32, i32, i32) {
    %c0_i32 = arith.constant 0 : i32
    %c0_i32_0 = arith.constant 0 : i32
    %c0_i32_1 = arith.constant 0 : i32
    %c0_i32_2 = arith.constant 0 : i32
    return %c0_i32, %c0_i32_0, %c0_i32_1 : i32, i32, i32
  }
  func.func @transform_3(%arg0: i32) -> (i32, i32, i32) {
    %c0_i32 = arith.constant 0 : i32
    %c0_i32_0 = arith.constant 0 : i32
    %c0_i32_1 = arith.constant 0 : i32
    return %arg0, %c0_i32, %c0_i32_0 : i32, i32, i32
  }
  func.func @transform_4(%arg0: i32) -> (i32, i32, i32) {
    %c0_i32 = arith.constant 0 : i32
    %c0_i32_0 = arith.constant 0 : i32
    %c0_i32_1 = arith.constant 0 : i32
    return %arg0, %c0_i32, %c0_i32_0 : i32, i32, i32
  }
  func.func @transform_5(%arg0: i32) -> (i32, i32, i32, i32) {
    %c0_i32 = arith.constant 0 : i32
    %c0_i32_0 = arith.constant 0 : i32
    %c0_i32_1 = arith.constant 0 : i32
    %c0_i32_2 = arith.constant 0 : i32
    return %arg0, %c0_i32, %c0_i32_0, %c0_i32_1 : i32, i32, i32, i32
  }
  func.func @transform_6(%arg0: i32) -> (i32, i32, i32, i32) {
    %c0_i32 = arith.constant 0 : i32
    %c0_i32_0 = arith.constant 0 : i32
    %c0_i32_1 = arith.constant 0 : i32
    %c0_i32_2 = arith.constant 0 : i32
    return %arg0, %c0_i32, %c0_i32_0, %c0_i32_1 : i32, i32, i32, i32
  }
  func.func @transform_7(%arg0: i32) -> (i32, i32, i32) {
    %c0_i32 = arith.constant 0 : i32
    %c0_i32_0 = arith.constant 0 : i32
    %c0_i32_1 = arith.constant 0 : i32
    return %arg0, %c0_i32, %c0_i32_0 : i32, i32, i32
  }
  func.func @transform_8(%arg0: i32) -> (i32, i32, i32) {
    %c0_i32 = arith.constant 0 : i32
    %c0_i32_0 = arith.constant 0 : i32
    %c0_i32_1 = arith.constant 0 : i32
    return %arg0, %c0_i32, %c0_i32_0 : i32, i32, i32
  }
  func.func @transform_9(%arg0: i32) -> (i32, i32, i32) {
    %c0_i32 = arith.constant 0 : i32
    %c0_i32_0 = arith.constant 0 : i32
    %c0_i32_1 = arith.constant 0 : i32
    return %arg0, %c0_i32, %c0_i32_0 : i32, i32, i32
  }
}

</mosaic_0001>

<bundles_post_ra>
// kernel: isoftshare_forward.1
= control target key start
LH: loop header
LB: loop body
LE: loop exit
PB: predicated region body
PF: predicated region fallthrough
CT: control target
= control target key end

     0   :  { %s2377_s30 = smov 0   ;;  %s2717_s0 = inlined_call_operand.vmem [shape: bf16[8,128], index: 0, kind: input, shape index: {}]   ;;  %s2718_s1 = inlined_call_operand.vmem [shape: bf16[2,128,128], index: 1, kind: input, shape index: {}]   ;;  %s2719_s2 = inlined_call_operand.vmem [shape: f32[2,1,128], index: 2, kind: input, shape index: {}]   ;;  %s2720_s3 = inlined_call_operand.vmem [shape: bf16[2,24,8], index: 3, kind: input, shape index: {}]   ;;  %s2721_s4 = inlined_call_operand.vmem [shape: f32[2,24,1], index: 4, kind: input, shape index: {}]   ;;  %s2722_s5 = inlined_call_operand.vmem [shape: bf16[2,4,128,128], index: 5, kind: input, shape index: {}]   ;;  %s2723_s6 = inlined_call_operand.vmem [shape: f32[2,4,1,128], index: 6, kind: input, shape index: {}]   ;;  %s2724_s7 = inlined_call_operand.vmem [shape: bf16[2,128,1], index: 7, kind: input, shape index: {}]   ;;  %s2725_s8 = inlined_call_operand.vmem [shape: f32[2,1,1], index: 8, kind: input, shape index: {}]   ;;  %s2726_s9 = inlined_call_operand.vmem [shape: f32[2,1,8], index: 9, kind: output, shape index: {}]  }
   0x1 LB: > { %s1772_s10 = sadd.s32 4294967295, %s2322_s30   ;;  %p1776_p0 = scmp.ge.s32.totalorder %s2322_s30, 1  ;;  %s2322_s30 = sphi %s2377_s30, %s19_s30  }
   0x2   : > { %p334_p1 = scmp.lt.s32.totalorder %s2322_s30, 3 }
   0x4   : > { %p335_p2 = pnand %p1776_p0, %p334_p1 }
   0x5   : > { %v2194_v0 = vld [vmem:[%s2718_s1] sm:$0xff] (!%p335_p2)   ;;  %v2324_v1 = vmov (!%p335_p2), 0.0   ;;  %v2195_v2 = vld [vmem:[%s2718_s1 + $0x8] sm:$0xff] (!%p335_p2)   ;;  %vm2325_vm0 = vmmov (!%p335_p2), 0   ;;  %v2196_v3 = vld [vmem:[%s2718_s1 + $0x10] sm:$0xff] (!%p335_p2)   ;;  %p390_p3 = scmp.lt.s32.totalorder (!%p335_p2), %s1772_s10, 1 }
   0x6   : > { %338 = sbr.rel (%p335_p2) target bundleno = 2712 (0xa98), region = 56  ;;  %2007 = vmatprep.subr.bf16.mxu0 (!%p335_p2), %v2324_v1  ;;  %2027 = vmatprep.subr.bf16.mxu1 (!%p335_p2), %v2324_v1  ;;  %v2202_v4 = vld [vmem:[%s2718_s1 + $0x40] sm:$0xff] (!%p335_p2)   ;;  %v2197_v5 = vld [vmem:[%s2718_s1 + $0x18] sm:$0xff] (!%p335_p2)   ;;  %v2203_v6 = vld [vmem:[%s2718_s1 + $0x48] sm:$0xff] (!%p335_p2)   ;;  %vm679_vm1 = vcmask (!%p335_p2), 64512   ;;  %v2326_v28 = vmov (!%p335_p2), 0  }
   0x7   : > { %2008 = vmatpush3.bf16.msra.mxu0 (!%p335_p2), %v2194_v0  ;;  %2023 = vmatprep.mubr.msk.bf16.mxu0 (!%p335_p2), %vm2325_vm0, %v2324_v1  ;;  %v2198_v7 = vld [vmem:[%s2718_s1 + $0x20] sm:$0xff] (!%p335_p2)   ;;  %v2204_v8 = vld [vmem:[%s2718_s1 + $0x50] sm:$0xff] (!%p335_p2)   ;;  %v2199_v9 = vld [vmem:[%s2718_s1 + $0x28] sm:$0xff] (!%p335_p2)   ;;  %vm686_vm2 = vcmask (!%p335_p2), 1043456   ;;  %vm1666_vm3 = vcmask (!%p335_p2), 57344  }
   0x8   : > { %2009 = vmatprep.subr.bf16.mxu0 (!%p335_p2), %v2324_v1  ;;  %2043 = vmatprep.mubr.msk.bf16.mxu1 (!%p335_p2), %vm2325_vm0, %v2324_v1  ;;  %v2205_v10 = vld [vmem:[%s2718_s1 + $0x58] sm:$0xff] (!%p335_p2)   ;;  %v2200_v11 = vld [vmem:[%s2718_s1 + $0x30] sm:$0xff] (!%p335_p2)   ;;  %v2206_v12 = vld [vmem:[%s2718_s1 + $0x60] sm:$0xff] (!%p335_p2)  }
   0x9   : > { %2028 = vmatpush3.bf16.msra.mxu1 (!%p335_p2), %v2202_v4  ;;  %v2201_v13 = vld [vmem:[%s2718_s1 + $0x38] sm:$0xff] (!%p335_p2)   ;;  %v2207_v14 = vld [vmem:[%s2718_s1 + $0x68] sm:$0xff] (!%p335_p2)   ;;  %v421_v15 = vld [vmem:[%s2717_s0] sm:$0xf] (!%p335_p2)  ;;  %2192 = vset.pattern.permute.xlu0 (!%p335_p2), %v2326_v28 }
   0xa   : > { %2029 = vmatprep.subr.bf16.mxu1 (!%p335_p2), %v2324_v1  ;;  %v2208_v16 = vld [vmem:[%s2718_s1 + $0x70] sm:$0xff] (!%p335_p2)   ;;  %v2209_v17 = vld [vmem:[%s2718_s1 + $0x78] sm:$0xff] (!%p335_p2)   ;;  %v1784_v18 = vld [vmem:[%s2719_s2] ss:$0 sm:$0xff] (!%p335_p2) }
   0xb   : > { %2010 = vmatpush3.bf16.msra.mxu0 (!%p335_p2), %v2195_v2  ;;  %v1810_v31 = vld [vmem:[%s2719_s2 + $0x1] ss:$0 sm:$0xff] (!%p335_p2) }
   0xc   : > { %2011 = vmatprep.subr.bf16.mxu0 (!%p335_p2), %v2324_v1 }
   0xd   : > { %2030 = vmatpush3.bf16.msra.mxu1 %v2203_v6  ;;  %s2728_s10 = smov (!%p390_p3, %s1772_s10), 1 }
   0xe   : > { %2031 = vmatprep.subr.bf16.mxu1 %v2324_v1  ;;  %s2179_s28 = smul.u32 12, %s2728_s10  ;;  %s1928_s13 = sshll.u32 %s2728_s10, 8 }
   0xf   : > { %2012 = vmatpush3.bf16.msra.mxu0 %v2196_v3  ;;  %s2473_s16 = scalar_lea.vmem %s2722_s5, %s1928_s13  ;;  %s2180_s17 = smul.u32 24, %s2728_s10 }
  0x10   : > { %2013 = vmatprep.subr.bf16.mxu0 %v2324_v1  ;;  %s394_s12 = scalar_lea.vmem %s2720_s3, %s2179_s28  ;;  %s1929_s21 = sshll.u32 %s2728_s10, 6 }
  0x11   : > { %2032 = vmatpush3.bf16.msra.mxu1 %v2204_v8  ;;  %v2210_v27 = vld [vmem:[%s394_s12] sm:$0xff]   ;;  %s2480_s20 = scalar_lea.vmem %s2721_s4, %s2180_s17  ;;  %s2488_s24 = scalar_lea.vmem %s2724_s7, %s1929_s21  ;;  %v2211_v39 = vld [vmem:[%s394_s12 + $0x8] ss:$0 sps:$4 sm:$0xff]  }
  0x12   : > { %2033 = vmatprep.subr.bf16.mxu1 %v2324_v1  ;;  %v653_v29 = vld [vmem:[%s2480_s20] sm:$0xff]  ;;  %v654_v30 = vld [vmem:[%s2480_s20 + $0x8] sm:$0xff]  ;;  %s416_s29 = scalar_lea.vmem %s2725_s8, %s2728_s10  ;;  %s1781_s11 = sshll.u32 %s2728_s10, 2 }
  0x13   : > { %2014 = vmatpush3.bf16.msra.mxu0 %v2197_v5  ;;  %658 = vperm.xlu0 %2192, %v653_v29   ;;  %s2673_s14 = scalar_lea.vmem %s2723_s6, %s1781_s11  ;;  %s419_s17 = scalar_lea.vmem %s2726_s9, %s2728_s10 }
  0x14   : > { %2015 = vmatprep.subr.bf16.mxu0 %v2324_v1 }
  0x15   : > { %2034 = vmatpush3.bf16.msra.mxu1 %v2205_v10 }
  0x16   : > { %2035 = vmatprep.subr.bf16.mxu1 %v2324_v1 }
  0x17   : > { %2016 = vmatpush3.bf16.msra.mxu0 %v2198_v7  ;;  %663 = vperm.xlu0 %2192, %v654_v30  }
  0x18   : > { %2017 = vmatprep.subr.bf16.mxu0 %v2324_v1 }
  0x19   : > { %2036 = vmatpush3.bf16.msra.mxu1 %v2206_v12 }
  0x1a   : > { %2037 = vmatprep.subr.bf16.mxu1 %v2324_v1 }
  0x1b   : > { %2018 = vmatpush3.bf16.msra.mxu0 %v2199_v9 }
  0x1c   : > { %2019 = vmatprep.subr.bf16.mxu0 %v2324_v1 }
  0x1d   : > { %2038 = vmatpush3.bf16.msra.mxu1 %v2207_v14 }
  0x1e   : > { %2039 = vmatprep.subr.bf16.mxu1 %v2324_v1 }
  0x1f   : > { %2020 = vmatpush3.bf16.msra.mxu0 %v2200_v11 }
  0x20   : > { %2021 = vmatprep.subr.bf16.mxu0 %v2324_v1 }
  0x21   : > { %2040 = vmatpush3.bf16.msra.mxu1 %v2208_v16 }
  0x22   : > { %2041 = vmatprep.subr.bf16.mxu1 %v2324_v1 }
  0x23   : > { %2022 = vmatpush3.bf16.msra.mxu0 %v2201_v13 }
  0x25   : > { %2042 = vmatpush3.bf16.msra.mxu1 %v2209_v17 }
  0x26   : > { %2024 = vmatmul.mubr.bf16.vlgmr.msra.gmra.mrb[0].mxu0 %v421_v15 }
  0x27   : > { %2049 = vmatprep.mubr.msk.bf16.mxu0 %vm679_vm1, %v2210_v27 }
  0x92   : > { %v659_v40 = vpop.permute.xlu0 %658 }
  0x96   : > { %v664_v45 = vpop.permute.xlu0 %663 }
  0xf9   : > { %v527_v19 = vpop.f32.mrb[0].mxu0 }
  0xfa   : > { %v528_v20 = vadd.f32 %v1784_v18, %v527_v19  ;;  %v2025_v21 = vpop.f32.mrb[1].mxu0 }
  0xfb   : > { %v530_v22 = vpop.f32.mrb[2].mxu0 }
  0xfc   : > { %v533_v23 = vmul.f32 0.01, %v528_v20  ;;  %v2026_v24 = vpop.f32.mrb[3].mxu0 }
  0xfe   : > { %v534_v25 = vmax.f32 %v528_v20, %v533_v23 }
 0x100   : > { %v552_v26 = vpack.c.bf16 %v534_v25, %v534_v25 }
 0x102   : > { %2044 = vmatmul.mubr.bf16.vlgmr.msra.gmra.mrb[0].mxu1 %v552_v26 }
 0x1d5   : > { %v643_v32 = vpop.f32.mrb[0].mxu1 }
 0x1d6   : > { %v2493_v33 = vadd.f32 %v1810_v31, %v643_v32  ;;  %v2045_v34 = vpop.f32.mrb[1].mxu1 }
 0x1d7   : > { %v646_v35 = vpop.f32.mrb[2].mxu1 }
 0x1d8   : > { %v649_v36 = vpack.c.bf16 %v2493_v33, %v2493_v33  ;;  %v2046_v37 = vpop.f32.mrb[3].mxu1 }
 0x1da   : > { %2177 = vmatprep.subr.msk.bf16.mxu0 %vm686_vm2, %v649_v36  ;;  %v688_v38 = vsel %vm686_vm2, %v649_v36, 0 }
 0x1db   : > { %2048 = vmatpush3.bf16.msra.mxu0 %v688_v38 }
 0x1dc   : > { %2071 = vmatprep.subr.bf16.mxu0 %v2324_v1 }
 0x1de   : > { %2050 = vmatmul.mubr.msk.bf16.vlgmr.msra.gmra.mrb[4].mxu0 %vm679_vm1, %v2211_v39 }
 0x1df   : > { %2087 = vmatprep.mubr.msk.bf16.mxu0 %vm2325_vm0, %v2324_v1 }
 0x2b1   : > { %v2503_v41 = vpop.f32.mrb[4].mxu0 }
 0x2b2   : > { %v724_v42 = vpop.f32.mrb[5].mxu0 }
 0x2b3   : > { %v2052_v43 = vpop.f32.mrb[6].mxu0  ;;  %v725_v44 = vadd.f32 %v724_v42, %v659_v40 }
 0x2b4   : > { %v727_v46 = vpop.f32.mrb[7].mxu0 }
 0x2b5   : > { %v728_v47 = vadd.f32 %v727_v46, %v664_v45  ;;  %v738_v48 = vpack.c.bf16 %v725_v44, %v725_v44 }
 0x2b7   : > { %v739_v49 = vpack.c.bf16 %v728_v47, %v728_v47  ;;  %740 = vxpose.xlu1.c.b16.start.end [1/1] (short) %v738_v48, 128 }
 0x2b9   : > { %v781_v50 = vsel %vm686_vm2, %v739_v49, 0  ;;  %2178 = vmatprep.subr.msk.bf16.mxu1 %vm686_vm2, %v739_v49 }
 0x2ba   : > { %2054 = vmatpush3.bf16.msra.mxu1 %v781_v50 }
 0x2bb   : > { %2193 = vset.pattern.permute.xlu1 %v2326_v28  ;;  %2091 = vmatprep.subr.bf16.mxu1 %v2324_v1 }
 0x31d   : > { %v748_v51 = vpop.trf.xlu1 }
 0x31e   : > { %2055 = vmatprep.mubr.msk.bf16.mxu1 %vm679_vm1, %v748_v51 }
 0x321   : > { %v749_v52 = vpop.trf.xlu1 }
 0x322   : > { %2056 = vmatmul.mubr.msk.bf16.vlgmr.msra.gmra.mrb[4].mxu1 %vm679_vm1, %v749_v52 }
 0x325   : > { %v750_v53 = vpop.trf.xlu1 }
 0x326   : > { %2059 = vmatprep.mubr.msk.bf16.mxu1 %vm679_vm1, %v750_v53 }
 0x329   : > { %v751_v54 = vpop.trf.xlu1 }
 0x32a   : > { %2060 = vmatmul.mubr.msk.bf16.gmra.mrb[8].mxu1 %vm679_vm1, %v751_v54 }
 0x32d   : > { %v752_v55 = vpop.trf.xlu1 }
 0x32e   : > { %2063 = vmatprep.mubr.msk.bf16.mxu1 %vm679_vm1, %v752_v55 }
 0x331   : > { %v753_v56 = vpop.trf.xlu1 }
 0x332   : > { %2064 = vmatmul.mubr.msk.bf16.gmra.mrb[12].mxu1 %vm679_vm1, %v753_v56 }
 0x335   : > { %v754_v57 = vpop.trf.xlu1 }
 0x336   : > { %2067 = vmatprep.mubr.msk.bf16.mxu1 %vm679_vm1, %v754_v57 }
 0x339   : > { %v755_v58 = vpop.trf.xlu1 }
 0x33a   : > { %2068 = vmatmul.mubr.msk.bf16.gmra.mrb[16].mxu1 %vm679_vm1, %v755_v58 }
 0x33b   : > { %2107 = vmatprep.mubr.msk.bf16.mxu1 %vm2325_vm0, %v2324_v1 }
 0x3f5   : > { %v2057_v59 = vpop.f32.mrb[4].mxu1 }
 0x3f6   : > { %v817_v60 = vpop.f32.mrb[5].mxu1 }
 0x3f7   : > { %880 = vmax.xlane.f32.xlu1 %v817_v60  ;;  %v2058_v61 = vpop.f32.mrb[6].mxu1 }
 0x3f8   : > { %v820_v62 = vpop.f32.mrb[7].mxu1 }
 0x3f9   : > { %882 = vmax.xlane.f32.xlu0 %v820_v62 }
 0x3fd   : > { %884 = vmax.xlane.f32.xlu0 %v2057_v59  ;;  %v2061_v63 = vpop.f32.mrb[8].mxu1 }
 0x3fe   : > { %v833_v0 = vpop.f32.mrb[9].mxu1 }
 0x3ff   : > { %888 = vmax.xlane.f32.xlu1 %v833_v0  ;;  %v2062_v2 = vpop.f32.mrb[10].mxu1 }
 0x400   : > { %v836_v3 = vpop.f32.mrb[11].mxu1 }
 0x401   : > { %886 = vmax.xlane.f32.xlu0 %v2058_v61 }
 0x403   : > { %892 = vmax.xlane.f32.xlu1 %v2061_v63 }
 0x405   : > { %890 = vmax.xlane.f32.xlu0 %v836_v3  ;;  %v2065_v4 = vpop.f32.mrb[12].mxu1 }
 0x406   : > { %v849_v5 = vpop.f32.mrb[13].mxu1 }
 0x407   : > { %896 = vmax.xlane.f32.xlu1 %v849_v5  ;;  %v2518_v6 = vpop.f32.mrb[14].mxu1 }
 0x408   : > { %v2520_v7 = vpop.f32.mrb[15].mxu1 }
 0x409   : > { %894 = vmax.xlane.f32.xlu0 %v2062_v2 }
 0x40b   : > { %900 = vmax.xlane.f32.xlu1 %v2065_v4 }
 0x40d   : > { %898 = vmax.xlane.f32.xlu0 %v2520_v7  ;;  %v2523_v8 = vpop.f32.mrb[16].mxu1 }
 0x40e   : > { %v2525_v9 = vpop.f32.mrb[17].mxu1 }
 0x40f   : > { %904 = vmax.xlane.f32.xlu1 %v2525_v9  ;;  %v2528_v10 = vpop.f32.mrb[18].mxu1 }
 0x410   : > { %v2530_v11 = vpop.f32.mrb[19].mxu1 }
 0x411   : > { %902 = vmax.xlane.f32.xlu0 %v2518_v6 }
 0x413   : > { %908 = vmax.xlane.f32.xlu1 %v2523_v8 }
 0x415   : > { %906 = vmax.xlane.f32.xlu0 %v2530_v11 }
 0x419   : > { %910 = vmax.xlane.f32.xlu0 %v2528_v10 }
 0x484   : > { %v881_v12 = vpop.xlane.xlu1 %880 }
 0x485   : > { %v912_v13 = vsub.f32 %v817_v60, %v881_v12 }
 0x486   : > { %v883_v14 = vpop.xlane.xlu0 %882 }
 0x487   : > { %v928_v15 = vmul.f32 1.442695, %v912_v13  ;;  %v913_v16 = vsub.f32 %v820_v62, %v883_v14 }
 0x489   : > { %2252 = vpow2.f32 %v928_v15  ;;  %v930_v17 = vmul.f32 1.442695, %v913_v16  ;;  %v655_v15 = vld [vmem:[%s2480_s20 + $0x10] sm:$0xff]  ;;  %v1552_v16 = vld [vmem:[%s416_s29] sm:$0x1] }
 0x48a   : > { %v885_v18 = vpop.xlane.xlu0 %884 }
 0x48b   : > { %2254 = vpow2.f32 %v930_v17  ;;  %v914_v19 = vsub.f32 %v2057_v59, %v885_v18  ;;  %v2212_v17 = vld [vmem:[%s2473_s16] sm:$0xff]   ;;  %v2213_v18 = vld [vmem:[%s2473_s16 + $0x8] sm:$0xff]  }
 0x48c   : > { %v889_v20 = vpop.xlane.xlu1 %888  ;;  %2092 = vmatpush3.bf16.msra.mxu1 %v2212_v17 }
 0x48d   : > { %v932_v21 = vmul.f32 1.442695, %v914_v19  ;;  %v916_v22 = vsub.f32 %v833_v0, %v889_v20  ;;  %2093 = vmatprep.subr.bf16.mxu1 %v2324_v1  ;;  %v2214_v19 = vld [vmem:[%s2473_s16 + $0x10] sm:$0xff]   ;;  %v2215_v20 = vld [vmem:[%s2473_s16 + $0x18] sm:$0xff]  }
 0x48e   : > { %v887_v23 = vpop.xlane.xlu0 %886 }
 0x48f   : > { %2256 = vpow2.f32 %v932_v21  ;;  %v936_v24 = vmul.f32 1.442695, %v916_v22  ;;  %v915_v25 = vsub.f32 %v2058_v61, %v887_v23  ;;  %v2216_v21 = vld [vmem:[%s2473_s16 + $0x20] sm:$0xff]   ;;  %v2217_v22 = vld [vmem:[%s2473_s16 + $0x28] sm:$0xff]   ;;  %v2218_v23 = vld [vmem:[%s2473_s16 + $0x30] sm:$0xff]  }
 0x490   : > { %v893_v26 = vpop.xlane.xlu1 %892  ;;  %2094 = vmatpush3.bf16.msra.mxu1 %v2213_v18 }
 0x491   : > { %v934_v27 = vmul.f32 1.442695, %v915_v25  ;;  %v918_v28 = vsub.f32 %v2061_v63, %v893_v26  ;;  %2258 = vpow2.f32 %v936_v24  ;;  %2095 = vmatprep.subr.bf16.mxu1 %v2324_v1 }
 0x492   : > { %v891_v29 = vpop.xlane.xlu0 %890 }
 0x493   : > { %v2536_v30 = vpop.eup %2252  ;;  %2260 = vpow2.f32 %v934_v27  ;;  %v940_v31 = vmul.f32 1.442695, %v918_v28  ;;  %v917_v32 = vsub.f32 %v836_v3, %v891_v29 }
 0x494   : > { %960 = vadd.xlane.f32.xlu1 %v2536_v30  ;;  %v897_v34 = vpop.xlane.xlu1 %896  ;;  %2096 = vmatpush3.bf16.msra.mxu1 %v2214_v19 }
 0x495   : > { %v2539_v35 = vpop.eup %2254  ;;  %v938_v36 = vmul.f32 1.442695, %v917_v32  ;;  %v920_v37 = vsub.f32 %v849_v5, %v897_v34  ;;  %2262 = vpow2.f32 %v940_v31  ;;  %2097 = vmatprep.subr.bf16.mxu1 %v2324_v1 }
 0x496   : > { %v895_v38 = vpop.xlane.xlu0 %894  ;;  %962 = vadd.xlane.f32.xlu0 %v2539_v35 }
 0x497   : > { %2264 = vpow2.f32 %v938_v36  ;;  %v944_v39 = vmul.f32 1.442695, %v920_v37  ;;  %v919_v40 = vsub.f32 %v2062_v2, %v895_v38 }
 0x498   : > { %v901_v42 = vpop.xlane.xlu1 %900  ;;  %2098 = vmatpush3.bf16.msra.mxu1 %v2215_v20 }
 0x499   : > { %v2542_v43 = vpop.eup %2256  ;;  %v942_v44 = vmul.f32 1.442695, %v919_v40  ;;  %v922_v45 = vsub.f32 %v2065_v4, %v901_v42  ;;  %2266 = vpow2.f32 %v944_v39  ;;  %2099 = vmatprep.subr.bf16.mxu1 %v2324_v1 }
 0x49a   : > { %v899_v46 = vpop.xlane.xlu0 %898  ;;  %964 = vadd.xlane.f32.xlu1 %v2542_v43 }
 0x49b   : > { %2268 = vpow2.f32 %v942_v44  ;;  %v948_v47 = vmul.f32 1.442695, %v922_v45  ;;  %v921_v48 = vsub.f32 %v2520_v7, %v899_v46  ;;  %v2546_v49 = vpop.eup %2258 }
 0x49c   : > { %v905_v50 = vpop.xlane.xlu1 %904  ;;  %2100 = vmatpush3.bf16.msra.mxu1 %v2216_v21 }
 0x49d   : > { %v2548_v51 = vpop.eup %2260  ;;  %v946_v52 = vmul.f32 1.442695, %v921_v48  ;;  %v924_v53 = vsub.f32 %v2525_v9, %v905_v50  ;;  %2270 = vpow2.f32 %v948_v47  ;;  %2101 = vmatprep.subr.bf16.mxu1 %v2324_v1 }
 0x49e   : > { %v903_v54 = vpop.xlane.xlu0 %902  ;;  %966 = vadd.xlane.f32.xlu0 %v2548_v51  ;;  %968 = vadd.xlane.f32.xlu1 %v2546_v49 }
 0x49f   : > { %2272 = vpow2.f32 %v946_v52  ;;  %v952_v55 = vmul.f32 1.442695, %v924_v53  ;;  %v923_v56 = vsub.f32 %v2518_v6, %v903_v54  ;;  %v2554_v57 = vpop.eup %2262 }
 0x4a0   : > { %v909_v58 = vpop.xlane.xlu1 %908  ;;  %2102 = vmatpush3.bf16.msra.mxu1 %v2217_v22 }
 0x4a1   : > { %v2556_v59 = vpop.eup %2264  ;;  %v950_v60 = vmul.f32 1.442695, %v923_v56  ;;  %v926_v61 = vsub.f32 %v2523_v8, %v909_v58  ;;  %2274 = vpow2.f32 %v952_v55  ;;  %2103 = vmatprep.subr.bf16.mxu1 %v2324_v1 }
 0x4a2   : > { %970 = vadd.xlane.f32.xlu0 %v2556_v59  ;;  %v907_v62 = vpop.xlane.xlu0 %906  ;;  %972 = vadd.xlane.f32.xlu1 %v2554_v57 }
 0x4a3   : > { %2276 = vpow2.f32 %v950_v60  ;;  %v956_v63 = vmul.f32 1.442695, %v926_v61  ;;  %v925_v0 = vsub.f32 %v2530_v11, %v907_v62  ;;  %v2562_v2 = vpop.eup %2266 }
 0x4a4   : > { %2104 = vmatpush3.bf16.msra.mxu1 %v2218_v23 }
 0x4a5   : > { %v2564_v3 = vpop.eup %2268  ;;  %v954_v4 = vmul.f32 1.442695, %v925_v0  ;;  %2278 = vpow2.f32 %v956_v63  ;;  %2105 = vmatprep.subr.bf16.mxu1 %v2324_v1 }
 0x4a6   : > { %974 = vadd.xlane.f32.xlu0 %v2564_v3  ;;  %v911_v5 = vpop.xlane.xlu0 %910  ;;  %976 = vadd.xlane.f32.xlu1 %v2562_v2 }
 0x4a7   : > { %2280 = vpow2.f32 %v954_v4  ;;  %v927_v6 = vsub.f32 %v2528_v10, %v911_v5  ;;  %v2569_v7 = vpop.eup %2270 }
 0x4a9   : > { %v2571_v8 = vpop.eup %2272  ;;  %v958_v9 = vmul.f32 1.442695, %v927_v6 }
 0x4aa   : > { %978 = vadd.xlane.f32.xlu0 %v2571_v8  ;;  %980 = vadd.xlane.f32.xlu1 %v2569_v7 }
 0x4ab   : > { %2282 = vpow2.f32 %v958_v9  ;;  %v2575_v11 = vpop.eup %2274 }
 0x4ad   : > { %v2577_v12 = vpop.eup %2276 }
 0x4ae   : > { %982 = vadd.xlane.f32.xlu0 %v2577_v12  ;;  %984 = vadd.xlane.f32.xlu1 %v2575_v11 }
 0x4af   : > { %v2581_v10 = vpop.eup %2278 }
 0x4b1   : > { %v2583_v13 = vpop.eup %2280 }
 0x4b2   : > { %986 = vadd.xlane.f32.xlu0 %v2583_v13  ;;  %988 = vadd.xlane.f32.xlu1 %v2581_v10 }
 0x4b5   : > { %v2587_v14 = vpop.eup %2282 }
 0x4b6   : > { %990 = vadd.xlane.f32.xlu0 %v2587_v14 }
 0x4c3   : > { %668 = vperm.xlu1 %2193, %v655_v15  }
 0x4c7   : > { %1555 = vperm.xlu1 %2193, %v1552_v16  }
 0x521   : > { %v961_v24 = vpop.xlane.xlu1 %960 }
 0x522   : > { %2284 = vrcp.f32 %v961_v24 }
 0x523   : > { %v963_v25 = vpop.xlane.xlu0 %962 }
 0x524   : > { %2286 = vrcp.f32 %v963_v25 }
 0x527   : > { %v965_v26 = vpop.xlane.xlu1 %964 }
 0x528   : > { %2288 = vrcp.f32 %v965_v26 }
 0x52b   : > { %v967_v27 = vpop.xlane.xlu0 %966  ;;  %v969_v31 = vpop.xlane.xlu1 %968 }
 0x52c   : > { %v2285_v28 = vpop.eup %2284  ;;  %2290 = vrcp.f32 %v967_v27 }
 0x52d   : > { %v1008_v34 = vmul.f32 %v2285_v28, %v2536_v30 }
 0x52e   : > { %v2287_v29 = vpop.eup %2286 }
 0x52f   : > { %v971_v32 = vpop.xlane.xlu0 %970  ;;  %v1009_v36 = vmul.f32 %v2287_v29, %v2539_v35  ;;  %v973_v42 = vpop.xlane.xlu1 %972  ;;  %v2221_v29 = vld [vmem:[%s2473_s16 + $0x48] sm:$0xff]  }
 0x530   : > { %2292 = vrcp.f32 %v971_v32  ;;  %v2224_v32 = vld [vmem:[%s2473_s16 + $0x60] sm:$0xff]  }
 0x531   : > { %v1025_v37 = vpack.c.bf16 %v1009_v36, %v1008_v34  ;;  %2294 = vrcp.f32 %v969_v31  ;;  %v2222_v31 = vld [vmem:[%s2473_s16 + $0x50] sm:$0xff]   ;;  %v2225_v34 = vld [vmem:[%s2473_s16 + $0x68] sm:$0xff]  }
 0x532   : > { %v2289_v38 = vpop.eup %2288  ;;  %v2226_v36 = vld [vmem:[%s2473_s16 + $0x70] sm:$0xff]  }
 0x533   : > { %2072 = vmatpush3.bf16.xpose.msra.mxu0 %v1025_v37  ;;  %v975_v39 = vpop.xlane.xlu0 %974  ;;  %v1010_v44 = vmul.f32 %v2289_v38, %v2542_v43  ;;  %v977_v50 = vpop.xlane.xlu1 %976  ;;  %v2227_v37 = vld [vmem:[%s2473_s16 + $0x78] sm:$0xff]   ;;  %v2228_v38 = vld [vmem:[%s2473_s16 + $0x80] sm:$0xff]  }
 0x534   : > { %2073 = vmatprep.subr.bf16.mxu0 %v2324_v1  ;;  %2296 = vrcp.f32 %v975_v39  ;;  %v2229_v39 = vld [vmem:[%s2473_s16 + $0x88] sm:$0xff]  }
 0x535   : > { %2298 = vrcp.f32 %v973_v42  ;;  %v2231_v42 = vld [vmem:[%s2473_s16 + $0x98] sm:$0xff]  }
 0x536   : > { %v2291_v40 = vpop.eup %2290 }
 0x537   : > { %v1011_v45 = vmul.f32 %v2291_v40, %v2548_v51  ;;  %v979_v35 = vpop.xlane.xlu0 %978  ;;  %v981_v56 = vpop.xlane.xlu1 %980  ;;  %v2230_v40 = vld [vmem:[%s2473_s16 + $0x90] sm:$0xff]  }
 0x538   : > { %2300 = vrcp.f32 %v979_v35 }
 0x539   : > { %v1026_v46 = vpack.c.bf16 %v1011_v45, %v1010_v44  ;;  %2302 = vrcp.f32 %v977_v50  ;;  %v2232_v44 = vld [vmem:[%s2473_s16 + $0xa0] sm:$0xff]   ;;  %v2233_v45 = vld [vmem:[%s2473_s16 + $0xa8] sm:$0xff]  }
 0x53a   : > { %v2293_v47 = vpop.eup %2292 }
 0x53b   : > { %2074 = vmatpush3.bf16.xpose.msra.mxu0 %v1026_v46  ;;  %v2295_v30 = vpop.eup %2294  ;;  %v1013_v48 = vmul.f32 %v2293_v47, %v2556_v59  ;;  %v983_v51 = vpop.xlane.xlu0 %982  ;;  %v1831_v46 = vld [vmem:[%s2673_s14] ss:$0 sm:$0xff] }
 0x53c   : > { %2075 = vmatprep.subr.bf16.mxu0 %v2324_v1  ;;  %v1012_v52 = vmul.f32 %v2295_v30, %v2546_v49  ;;  %2304 = vrcp.f32 %v983_v51  ;;  %v985_v63 = vpop.xlane.xlu1 %984  ;;  %v2235_v51 = vld [vmem:[%s2473_s16 + $0xb8] sm:$0xff]  }
 0x53d   : > { %2306 = vrcp.f32 %v981_v56  ;;  %v2237_v56 = vld [vmem:[%s2473_s16 + $0xc8] sm:$0xff]  }
 0x53e   : > { %v1027_v53 = vpack.c.bf16 %v1013_v48, %v1012_v52  ;;  %v2297_v54 = vpop.eup %2296 }
 0x53f   : > { %v2299_v43 = vpop.eup %2298  ;;  %v1015_v55 = vmul.f32 %v2297_v54, %v2564_v3  ;;  %v987_v61 = vpop.xlane.xlu0 %986 }
 0x540   : > { %v1014_v58 = vmul.f32 %v2299_v43, %v2554_v57  ;;  %2308 = vrcp.f32 %v987_v61  ;;  %v989_v9 = vpop.xlane.xlu1 %988  ;;  %v2234_v43 = vld [vmem:[%s2473_s16 + $0xb0] sm:$0xff]   ;;  %v1857_v61 = vld [vmem:[%s2673_s14 + $0x1] ss:$0 sm:$0xff] }
 0x541   : > { %2310 = vrcp.f32 %v985_v63 }
 0x542   : > { %v1028_v60 = vpack.c.bf16 %v1015_v55, %v1014_v58  ;;  %v2301_v59 = vpop.eup %2300  ;;  %v2236_v55 = vld [vmem:[%s2473_s16 + $0xc0] sm:$0xff]   ;;  %v2238_v58 = vld [vmem:[%s2473_s16 + $0xd0] sm:$0xff]  }
 0x543   : > { %2076 = vmatpush3.bf16.xpose.msra.mxu0 %v1027_v53  ;;  %v2303_v49 = vpop.eup %2302  ;;  %v1017_v62 = vmul.f32 %v2301_v59, %v2571_v8  ;;  %v991_v5 = vpop.xlane.xlu0 %990  ;;  %v2240_v59 = vld [vmem:[%s2473_s16 + $0xe0] sm:$0xff]  }
 0x544   : > { %2077 = vmatprep.subr.bf16.mxu0 %v2324_v1  ;;  %v1016_v0 = vmul.f32 %v2303_v49, %v2562_v2  ;;  %2312 = vrcp.f32 %v991_v5  ;;  %v669_v22 = vpop.permute.xlu1 %668  ;;  %v2241_v49 = vld [vmem:[%s2473_s16 + $0xe8] sm:$0xff]  }
 0x545   : > { %2314 = vrcp.f32 %v989_v9  ;;  %v733_v24 = vadd.f32 %v2503_v41, %v669_v22  ;;  %v2220_v41 = vld [vmem:[%s2473_s16 + $0x40] sm:$0xff]   ;;  %v2242_v9 = vld [vmem:[%s2473_s16 + $0xf0] sm:$0xff]  }
 0x546   : > { %v1029_v4 = vpack.c.bf16 %v1017_v62, %v1016_v0  ;;  %v2305_v3 = vpop.eup %2304 }
 0x547   : > { %v2307_v57 = vpop.eup %2306  ;;  %v1019_v6 = vmul.f32 %v2305_v3, %v2577_v12 }
 0x548   : > { %v1018_v15 = vmul.f32 %v2307_v57, %v2569_v7 }
 0x54a   : > { %v1030_v16 = vpack.c.bf16 %v1019_v6, %v1018_v15  ;;  %v2309_v8 = vpop.eup %2308  ;;  %v2243_v15 = vld [vmem:[%s2473_s16 + $0xf8] sm:$0xff]  }
 0x54b   : > { %2078 = vmatpush3.bf16.xpose.msra.mxu0 %v1028_v60  ;;  %v2311_v2 = vpop.eup %2310  ;;  %v1021_v17 = vmul.f32 %v2309_v8, %v2583_v13  ;;  %v2219_v13 = vld [vmem:[%s2473_s16 + $0x38] sm:$0xff]   ;;  %v2245_v8 = vld [vmem:[%s2488_s24 + $0x8] sm:$0xff]  }
 0x54c   : > { %2079 = vmatprep.subr.bf16.mxu0 %v2324_v1  ;;  %v1020_v18 = vmul.f32 %v2311_v2, %v2575_v11  ;;  %v1024_v11 = vpack.c.bf16 %v733_v24, %v733_v24  ;;  %2106 = vmatpush3.bf16.msra.mxu1 %v2219_v13  ;;  %v2239_v60 = vld [vmem:[%s2473_s16 + $0xd8] sm:$0xff]   ;;  %v2246_v2 = vld [vmem:[%s2488_s24 + $0x10] sm:$0xff]  }
 0x54d   : > { %2111 = vmatprep.subr.bf16.mxu1 %v2324_v1 }
 0x54e   : > { %v1031_v19 = vpack.c.bf16 %v1021_v17, %v1020_v18  ;;  %v2313_v20 = vpop.eup %2312  ;;  %v2247_v17 = vld [vmem:[%s2488_s24 + $0x18] sm:$0xff]   ;;  %v2248_v18 = vld [vmem:[%s2488_s24 + $0x20] sm:$0xff]  }
 0x54f   : > { %v2315_v12 = vpop.eup %2314  ;;  %v1023_v7 = vmul.f32 %v2313_v20, %v2587_v14  ;;  %v2250_v20 = vld [vmem:[%s2488_s24 + $0x30] sm:$0xff]  }
 0x550   : > { %v1022_v21 = vmul.f32 %v2315_v12, %v2581_v10  ;;  %v1883_v12 = vld [vmem:[%s2673_s14 + $0x2] ss:$0 sm:$0xff] }
 0x552   : > { %v1032_v23 = vpack.c.bf16 %v1023_v7, %v1022_v21 }
 0x553   : > { %2080 = vmatpush3.bf16.xpose.msra.mxu0 %v1029_v4 }
 0x554   : > { %2081 = vmatprep.subr.bf16.mxu0 %v2324_v1 }
 0x55b   : > { %2082 = vmatpush3.bf16.xpose.msra.mxu0 %v1030_v16  ;;  %v2244_v16 = vld [vmem:[%s2488_s24] sm:$0xff]  }
 0x55c   : > { %2083 = vmatprep.subr.bf16.mxu0 %v2324_v1  ;;  %1610 = vxpose.xlu0.c.b16.start [1/8] (narrow) %v2244_v16, 16 }
 0x560   : > { %1611 = vxpose.xlu0.c.b16.cont [2/8] (narrow) %v2245_v8, 16 }
 0x563   : > { %2084 = vmatpush3.bf16.xpose.msra.mxu0 %v1031_v19  ;;  %v2249_v19 = vld [vmem:[%s2488_s24 + $0x28] sm:$0xff]  }
 0x564   : > { %2085 = vmatprep.subr.bf16.mxu0 %v2324_v1  ;;  %1612 = vxpose.xlu0.c.b16.cont [3/8] (narrow) %v2246_v2, 16 }
 0x568   : > { %1613 = vxpose.xlu0.c.b16.cont [4/8] (narrow) %v2247_v17, 16 }
 0x56b   : > { %2086 = vmatpush3.bf16.xpose.msra.mxu0 %v1032_v23 }
 0x56c   : > { %2131 = vmatprep.subr.bf16.mxu0 %v2324_v1  ;;  %1614 = vxpose.xlu0.c.b16.cont [5/8] (narrow) %v2248_v18, 16 }
 0x570   : > { %1615 = vxpose.xlu0.c.b16.cont [6/8] (narrow) %v2249_v19, 16 }
 0x572   : > { %2088 = vmatmul.mubr.bf16.vlgmr.msra.gmra.mrb[8].mxu0 %v1024_v11 }
 0x573   : > { %2147 = vmatprep.mubr.msk.bf16.mxu0 %vm2325_vm0, %v2324_v1  ;;  %2132 = vmatpush3.bf16.msra.mxu0 %v2228_v38  ;;  %v1556_v38 = vpop.permute.xlu1 %1555 }
 0x574   : > { %2133 = vmatprep.subr.bf16.mxu0 %v2324_v1  ;;  %1616 = vxpose.xlu0.c.b16.cont [7/8] (narrow) %v2250_v20, 16 }
 0x577   : > { %2134 = vmatpush3.bf16.msra.mxu0 %v2229_v39 }
 0x578   : > { %2135 = vmatprep.subr.bf16.mxu0 %v2324_v1 }
 0x57b   : > { %2136 = vmatpush3.bf16.msra.mxu0 %v2230_v40 }
 0x57c   : > { %2137 = vmatprep.subr.bf16.mxu0 %v2324_v1 }
 0x57f   : > { %2138 = vmatpush3.bf16.msra.mxu0 %v2231_v42 }
 0x580   : > { %2139 = vmatprep.subr.bf16.mxu0 %v2324_v1 }
 0x583   : > { %2140 = vmatpush3.bf16.msra.mxu0 %v2232_v44 }
 0x584   : > { %2141 = vmatprep.subr.bf16.mxu0 %v2324_v1 }
 0x587   : > { %2142 = vmatpush3.bf16.msra.mxu0 %v2233_v45 }
 0x588   : > { %2143 = vmatprep.subr.bf16.mxu0 %v2324_v1 }
 0x58b   : > { %2144 = vmatpush3.bf16.msra.mxu0 %v2234_v43 }
 0x58c   : > { %2145 = vmatprep.subr.bf16.mxu0 %v2324_v1 }
 0x58f   : > { %2146 = vmatpush3.bf16.msra.mxu0 %v2235_v51 }
 0x590   : > { %2171 = vmatprep.subr.bf16.mxu0 %v2324_v1 }
 0x645   : > { %v1067_v10 = vpop.f32.mrb[8].mxu0 }
 0x646   : > { %v1068_v14 = vadd.f32 %v1067_v10, %v2493_v33  ;;  %v2089_v25 = vpop.f32.mrb[9].mxu0  ;;  %v2223_v33 = vld [vmem:[%s2473_s16 + $0x58] sm:$0xff]  }
 0x647   : > { %v1070_v26 = vpop.f32.mrb[10].mxu0 }
 0x648   : > { %v1089_v27 = vpack.c.bf16 %v1068_v14, %v1068_v14  ;;  %v2090_v28 = vpop.f32.mrb[11].mxu0  ;;  %v1909_v14 = vld [vmem:[%s2673_s14 + $0x3] ss:$0 sm:$0xff] }
 0x64a   : > { %2108 = vmatmul.mubr.bf16.vlgmr.msra.gmra.mrb[20].mxu1 %v1089_v27 }
 0x64b   : > { %2112 = vmatpush3.bf16.msra.mxu1 %v2220_v41  ;;  %2127 = vmatprep.mubr.msk.bf16.mxu1 %vm2325_vm0, %v2324_v1 }
 0x64c   : > { %2113 = vmatprep.subr.bf16.mxu1 %v2324_v1 }
 0x64f   : > { %2114 = vmatpush3.bf16.msra.mxu1 %v2221_v29 }
 0x650   : > { %2115 = vmatprep.subr.bf16.mxu1 %v2324_v1 }
 0x653   : > { %2116 = vmatpush3.bf16.msra.mxu1 %v2222_v31 }
 0x654   : > { %2117 = vmatprep.subr.bf16.mxu1 %v2324_v1 }
 0x657   : > { %2118 = vmatpush3.bf16.msra.mxu1 %v2223_v33 }
 0x658   : > { %2119 = vmatprep.subr.bf16.mxu1 %v2324_v1 }
 0x65b   : > { %2120 = vmatpush3.bf16.msra.mxu1 %v2224_v32 }
 0x65c   : > { %2121 = vmatprep.subr.bf16.mxu1 %v2324_v1 }
 0x65f   : > { %2122 = vmatpush3.bf16.msra.mxu1 %v2225_v34  ;;  %v1558_v34 = vlaneseq }
 0x660   : > { %2123 = vmatprep.subr.bf16.mxu1 %v2324_v1 }
 0x663   : > { %2124 = vmatpush3.bf16.msra.mxu1 %v2226_v36  ;;  %v1559_v36 = vshrl.u32 %v1558_v34, 7 }
 0x664   : > { %2125 = vmatprep.subr.bf16.mxu1 %v2324_v1 }
 0x667   : > { %2126 = vmatpush3.bf16.msra.mxu1 %v2227_v37  ;;  %v1560_v37 = vsub.s32 0, %v1559_v36 }
 0x668   : > { %2151 = vmatprep.subr.bf16.mxu1 %v2324_v1 }
 0x669   : > { %v1561_v39 = vrot.slane %v1556_v38, %v1560_v37 }
 0x71d   : > { %v1179_v47 = vpop.f32.mrb[20].mxu1 }
 0x71e   : > { %v1180_v30 = vadd.f32 %v1831_v46, %v1179_v47  ;;  %v2109_v35 = vpop.f32.mrb[21].mxu1 }
 0x71f   : > { %v1182_v48 = vpop.f32.mrb[22].mxu1 }
 0x720   : > { %v1185_v50 = vmul.f32 0.01, %v1180_v30  ;;  %v2110_v52 = vpop.f32.mrb[23].mxu1 }
 0x722   : > { %v1186_v53 = vmax.f32 %v1180_v30, %v1185_v50 }
 0x724   : > { %v1204_v54 = vpack.c.bf16 %v1186_v53, %v1186_v53 }
 0x726   : > { %2128 = vmatmul.mubr.bf16.vlgmr.msra.gmra.mrb[24].mxu1 %v1204_v54 }
 0x727   : > { %2167 = vmatprep.mubr.msk.bf16.mxu1 %vm2325_vm0, %v2324_v1  ;;  %2152 = vmatpush3.bf16.msra.mxu1 %v2236_v55 }
 0x728   : > { %2153 = vmatprep.subr.bf16.mxu1 %v2324_v1 }
 0x72b   : > { %2154 = vmatpush3.bf16.msra.mxu1 %v2237_v56 }
 0x72c   : > { %2155 = vmatprep.subr.bf16.mxu1 %v2324_v1 }
 0x72f   : > { %2156 = vmatpush3.bf16.msra.mxu1 %v2238_v58 }
 0x730   : > { %2157 = vmatprep.subr.bf16.mxu1 %v2324_v1 }
 0x733   : > { %2158 = vmatpush3.bf16.msra.mxu1 %v2239_v60 }
 0x734   : > { %2159 = vmatprep.subr.bf16.mxu1 %v2324_v1 }
 0x737   : > { %2160 = vmatpush3.bf16.msra.mxu1 %v2240_v59 }
 0x738   : > { %2161 = vmatprep.subr.bf16.mxu1 %v2324_v1 }
 0x73b   : > { %2162 = vmatpush3.bf16.msra.mxu1 %v2241_v49 }
 0x73c   : > { %2163 = vmatprep.subr.bf16.mxu1 %v2324_v1 }
 0x73f   : > { %2164 = vmatpush3.bf16.msra.mxu1 %v2242_v9 }
 0x740   : > { %2165 = vmatprep.subr.bf16.mxu1 %v2324_v1 }
 0x743   : > { %2166 = vmatpush3.bf16.msra.mxu1 %v2243_v15 }
 0x7f9   : > { %v1295_v62 = vpop.f32.mrb[24].mxu1 }
 0x7fa   : > { %v1296_v63 = vadd.f32 %v1857_v61, %v1295_v62  ;;  %v2129_v0 = vpop.f32.mrb[25].mxu1 }
 0x7fb   : > { %v1298_v4 = vpop.f32.mrb[26].mxu1 }
 0x7fc   : > { %v1301_v3 = vmul.f32 0.01, %v1296_v63  ;;  %v2130_v57 = vpop.f32.mrb[27].mxu1 }
 0x7fe   : > { %v1302_v5 = vmax.f32 %v1296_v63, %v1301_v3 }
 0x800   : > { %v1320_v6 = vpack.c.bf16 %v1302_v5, %v1302_v5 }
 0x802   : > { %2148 = vmatmul.mubr.bf16.vlgmr.msra.gmra.mrb[12].mxu0 %v1320_v6 }
 0x803   : > { %2173 = vmatprep.mubr.msk.bf16.mxu0 %vm2325_vm0, %v2324_v1  ;;  %v2251_v1 = vld [vmem:[%s2488_s24 + $0x38] sm:$0xff]  }
 0x804   : > { %1617 = vxpose.xlu0.c.b16.end [8/8] (narrow) %v2251_v1, 16 }
 0x84e   : > { %v1618_v32 = vpop.trf.xlu0 }
 0x8d5   : > { %v1411_v7 = vpop.f32.mrb[12].mxu0 }
 0x8d6   : > { %v1412_v21 = vadd.f32 %v1883_v12, %v1411_v7  ;;  %v2149_v22 = vpop.f32.mrb[13].mxu0 }
 0x8d7   : > { %v1414_v23 = vpop.f32.mrb[14].mxu0 }
 0x8d8   : > { %v1417_v24 = vmul.f32 0.01, %v1412_v21  ;;  %v2150_v11 = vpop.f32.mrb[15].mxu0 }
 0x8da   : > { %v1418_v13 = vmax.f32 %v1412_v21, %v1417_v24 }
 0x8dc   : > { %v1436_v10 = vpack.c.bf16 %v1418_v13, %v1418_v13 }
 0x8de   : > { %2168 = vmatmul.mubr.bf16.vlgmr.msra.gmra.mrb[28].mxu1 %v1436_v10 }
 0x9b1   : > { %v1527_v25 = vpop.f32.mrb[28].mxu1 }
 0x9b2   : > { %v1528_v26 = vadd.f32 %v1909_v14, %v1527_v25  ;;  %v2169_v41 = vpop.f32.mrb[29].mxu1 }
 0x9b3   : > { %v1530_v27 = vpop.f32.mrb[30].mxu1 }
 0x9b4   : > { %v1533_v28 = vmul.f32 0.01, %v1528_v26  ;;  %v2170_v29 = vpop.f32.mrb[31].mxu1 }
 0x9b6   : > { %v1534_v31 = vmax.f32 %v1528_v26, %v1533_v28 }
 0x9b8   : > { %v1551_v33 = vpack.c.bf16 %v1534_v31, %v1534_v31 }
 0x9ba   : > { %2172 = vmatpush3.bf16.xpose.msra.mxu0 %v1551_v33 }
 0x9c1   : > { %2174 = vmatmul.mubr.bf16.vlgmr.msra.gmra.mrb[16].mxu0 %v1618_v32 }
 0xa94   : > { %v1660_v40 = vpop.f32.mrb[16].mxu0 }
 0xa95   : > { %v1661_v42 = vadd.f32 %v1660_v40, %v1561_v39  ;;  %v2175_v44 = vpop.f32.mrb[17].mxu0 }
 0xa96   : > { %v1663_v45 = vpop.f32.mrb[18].mxu0 }
 0xa97   : > { %1667 = vst.msk [vmem:[%s419_s17] sm:$0x1] %vm1666_vm3, %v1661_v42  ;;  %v2176_v46 = vpop.f32.mrb[19].mxu0 }
 0xa98 PF: > { %s19_s30 = sadd.s32 1, %s2322_s30  }
 0xa99   : > { %p16_p4 = scmp.ge.s32.totalorder %s19_s30, 4  }
 0xa9b   :  { %18 = sbr.rel (!%p16_p4) target bundleno = 1 (0x1), region = 109 }

</bundles_post_ra>
